<compile_context>
chip_gen: v7x
topology: tpu7x:2x2x1
jax: 0.10.0
libtpu: 0.0.40
codegen_flags: <defaults>
</compile_context>

<pallas_src>
import jax
import jax.numpy as jnp
from jax.experimental import pallas as pl
from jax.experimental.pallas import tpu as pltpu


_P = 128      # padded hidden width for the tiny MHN matmuls
_LANE = 128   # TPU lane width


# ---------------------------------------------------------------------------
# Stage 1: per-(sample, channel) gate, batched over all N samples.
# ---------------------------------------------------------------------------
def _scale_kernel(w1_ref, pooled_ref, wr_ref, br_ref, wf1_ref, bf1_ref,
                  t_ref, m35_ref, s_ref):
    pooled = pooled_ref[...]                                            # (N, C)
    C = pooled.shape[-1]

    # --- MHN: reduce (C->16) then wn_fc1 (16->6) + sigmoid.  Weights are
    # zero-padded to width _P in glue so every contraction is 128 wide.
    r = jnp.dot(pooled, wr_ref[...],
                preferred_element_type=jnp.float32) + br_ref[...]       # (N, P)
    g = jax.nn.sigmoid(
        jnp.dot(r, wf1_ref[...], preferred_element_type=jnp.float32)
        + bf1_ref[...])                                                 # (N, P)
    # Explicitly zero the padded columns (>= 6) so correctness does not rely
    # on the zero rows of T.
    col = jax.lax.broadcasted_iota(jnp.int32, g.shape, 1)
    g = jnp.where(col < 6, g, 0.0)

    # --- grouped wn_fc2 fused with the per-sample 1x1x1 dynamic conv as ONE
    # dot: Tflat[j, o*C+c] = w_fc2[o*C+c] * [j == (o*C+c)//64]
    q = jnp.dot(g, t_ref[...], preferred_element_type=jnp.float32)      # (N, 3C)
    d0 = jnp.sum(q[:, 0:C] * pooled, axis=-1, keepdims=True)            # (N, 1)
    d1 = jnp.sum(q[:, C:2 * C] * pooled, axis=-1, keepdims=True)
    d2 = jnp.sum(q[:, 2 * C:3 * C] * pooled, axis=-1, keepdims=True)

    # --- ECA-style Conv1d over the channel axis: scalar (from SMEM) for k=1,
    # ONE fused (C, 2C) banded matmul for k=3 / k=5 (fills a 256-wide MXU).
    w1 = w1_ref[0]
    y1s = jax.nn.sigmoid(pooled * w1)
    y35 = jnp.dot(pooled, m35_ref[...], preferred_element_type=jnp.float32)
    y3s = jax.nn.sigmoid(y35[:, :C])
    y5s = jax.nn.sigmoid(y35[:, C:])

    # torch: x*y1*weight[:,0] + x*y5*weight[:,1] + x*y3*weight[:,2]
    s_ref[...] = y1s * d0 + y5s * d1 + y3s * d2


# ---------------------------------------------------------------------------
# Stage 2: streaming apply, out = x * scale (HBM-roofline bound).
# ---------------------------------------------------------------------------
def _apply_kernel(x_ref, s_ref, o_ref):
    n = pl.program_id(0)
    # s_ref is the full (N, C, 1) gate, resident in VMEM; pick this sample's
    # row and broadcast it along the spatial lanes.  Store in x's dtype.
    o_ref[...] = (x_ref[...] * s_ref[n]).astype(o_ref.dtype)


def _tpu_kind():
    try:
        return jax.devices()[0].device_kind.lower()
    except Exception:
        return ""


def _pick_apply_tiling(N, L):
    """Generation-aware lane-tile size + VMEM limit for the streaming stage."""
    kind = _tpu_kind()
    if "v5" in kind:
        tl_max, vmem_limit = 2048, 32 * 1024 * 1024   # 1 MiB tiles
    elif "v6" in kind:
        tl_max, vmem_limit = 4096, 40 * 1024 * 1024   # 2 MiB tiles
    elif "v7" in kind or "7x" in kind:
        tl_max, vmem_limit = 8192, 28 * 1024 * 1024   # 4 MiB tiles, 64 MiB phys
    else:
        tl_max, vmem_limit = 2048, 32 * 1024 * 1024   # conservative default
    if L < _LANE:
        # Block equals the full (small) spatial extent; stores are masked but
        # the data is tiny, so this is correctness-only territory.
        return L, vmem_limit
    # Keep the lane dimension a multiple of 128 -> unmasked vst except the
    # ragged last tile (handled by Pallas boundary masking).
    tl = min(tl_max, (L // _LANE) * _LANE)
    # Keep a few parallel grid steps so both v7x TensorCores (and the DMA
    # pipeline) stay busy even at small N.
    while N * (-(-L // tl)) < 4 and tl > _LANE:
        tl = max(_LANE, (tl // 2) // _LANE * _LANE)
    return tl, vmem_limit


def local_attention(x, params, *, donate_x=False):
    """x: (N, C, S, H, W); C must be 128 (module hardcodes MHN(128, 3, ...)).

    The apply stage streams x in its native dtype (pass bf16 to halve HBM
    traffic); the gate itself is always computed in f32.  `donate_x=True`
    aliases x's HBM buffer with the output (only if the caller no longer
    needs x).
    """
    N, C, S, H, W = x.shape
    assert C == 128, "LocalAttention hardcodes MHN(128, 3, ...)"
    L = S * H * W
    P = _P

    # Free reshape — keep the native NC(SHW) layout, no transposes.
    x3 = x.reshape(N, C, L)
    # AdaptiveAvgPool3d((1,1,1)) over the flattened spatial axis (f32 accum).
    pooled = jnp.mean(x3, axis=2, dtype=jnp.float32)                    # (N, C)

    # ---- pack the tiny weights ---------------------------------------------
    # reduce: Conv3d(C, 16, 1, bias=True)
    wr_p = jnp.zeros((C, P), jnp.float32).at[:, :16].set(
        params["w_reduce"].astype(jnp.float32).T)
    br_p = jnp.zeros((1, P), jnp.float32).at[0, :16].set(
        params["b_reduce"].astype(jnp.float32))
    # wn_fc1: Conv3d(16, 6, 1, bias=True)
    wf1_p = jnp.zeros((P, P), jnp.float32).at[:16, :6].set(
        params["w_fc1"].astype(jnp.float32).T)
    bf1_p = jnp.zeros((1, P), jnp.float32).at[0, :6].set(
        params["b_fc1"].astype(jnp.float32))
    # wn_fc2 (Conv3d(6, 3*C, 1, groups=6, bias=False)) fused with the
    # per-sample dynamic conv into one flattened masked matrix.
    f = jnp.arange(3 * C)
    t_flat = jnp.zeros((P, 3 * C), jnp.float32).at[f // 64, f].set(
        params["w_fc2"].astype(jnp.float32))
    # Conv1d(1,1,k) over channels: scalar for k=1; banded C x C matrices for
    # k=3/5 concatenated into ONE (C, 2C) weight (single 256-wide MXU push).
    w1 = params["w1"].astype(jnp.float32).reshape(1)
    w3 = params["w3"].astype(jnp.float32)
    w5 = params["w5"].astype(jnp.float32)
    d = jnp.arange(C)[:, None] - jnp.arange(C)[None, :]
    m3 = jnp.where((d >= -1) & (d <= 1), w3[jnp.clip(d + 1, 0, 2)], 0.0)
    m5 = jnp.where((d >= -2) & (d <= 2), w5[jnp.clip(d + 2, 0, 4)], 0.0)
    m35 = jnp.concatenate([m3, m5], axis=1).astype(jnp.float32)         # (C, 2C)

    # ---- stage 1: per-sample, per-channel gate (tiny, batched over N) ------
    scale = pl.pallas_call(
        _scale_kernel,
        out_shape=jax.ShapeDtypeStruct((N, C), jnp.float32),
        grid=(1,),
        in_specs=[
            pl.BlockSpec(memory_space=pltpu.MemorySpace.SMEM),   # w1 scalar
            pl.BlockSpec((N, C), lambda i: (0, 0)),              # pooled
            pl.BlockSpec((C, P), lambda i: (0, 0)),              # reduce weight
            pl.BlockSpec((1, P), lambda i: (0, 0)),              # reduce bias
            pl.BlockSpec((P, P), lambda i: (0, 0)),              # fc1 weight
            pl.BlockSpec((1, P), lambda i: (0, 0)),              # fc1 bias
            pl.BlockSpec((P, 3 * C), lambda i: (0, 0)),          # fused fc2/dyn
            pl.BlockSpec((C, 2 * C), lambda i: (0, 0)),          # conv3|conv5
        ],
        out_specs=pl.BlockSpec((N, C), lambda i: (0, 0)),
    )(w1, pooled, wr_p, br_p, wf1_p, bf1_p, t_flat, m35)

    # ---- stage 2: stream x and apply the gate (HBM-bandwidth bound) --------
    tl, vmem_limit = _pick_apply_tiling(N, L)
    grid = (N, pl.cdiv(L, tl))

    out = pl.pallas_call(
        _apply_kernel,
        out_shape=jax.ShapeDtypeStruct((N, C, L), x.dtype),
        grid=grid,
        in_specs=[
            # x tile: lane-dense (1, C, tl) blocks.
            pl.BlockSpec((1, C, tl), lambda n, l: (n, 0, l)),
            # gate: resident in VMEM for the whole grid (constant index_map).
            pl.BlockSpec((N, C, 1), lambda n, l: (0, 0, 0)),
        ],
        out_specs=pl.BlockSpec((1, C, tl), lambda n, l: (n, 0, l)),
        compiler_params=pltpu.CompilerParams(
            dimension_semantics=("parallel", "parallel"),
            vmem_limit_bytes=vmem_limit),
        input_output_aliases=({0: 0} if donate_x else {}),
    )(x3, scale.reshape(N, C, 1))

    return out.reshape(N, C, S, H, W)


def local_attention_ref(x, params):
    """Pure-JAX reference mirroring the PyTorch forward (for verification)."""
    N, C = x.shape[:2]
    pooled = x.astype(jnp.float32).mean(axis=(2, 3, 4))                # (N, C)
    xg = pooled @ params["w_reduce"].T + params["b_reduce"]           # (N, 16)
    g = jax.nn.sigmoid(xg @ params["w_fc1"].T + params["b_fc1"])      # (N, 6)
    f = jnp.arange(3 * C)
    xw2 = params["w_fc2"][None, :] * g[:, f // 64]                    # (N, 3C)
    dyn = jnp.einsum("noc,nc->no", xw2.reshape(N, 3, C), pooled)      # (N, 3)
    y = pooled
    y1 = jax.nn.sigmoid(y * params["w1"][0])
    yp3 = jnp.pad(y, ((0, 0), (1, 1)))
    y3 = jax.nn.sigmoid(sum(params["w3"][t] * yp3[:, t:t + C] for t in range(3)))
    yp5 = jnp.pad(y, ((0, 0), (2, 2)))
    y5 = jax.nn.sigmoid(sum(params["w5"][t] * yp5[:, t:t + C] for t in range(5)))
    scale = y1 * dyn[:, 0:1] + y5 * dyn[:, 1:2] + y3 * dyn[:, 2:3]
    return x * scale[:, :, None, None, None]


def make_params(key, C=128):
    ks = jax.random.split(key, 8)
    s = 0.1
    return {
        "w_reduce": jax.random.normal(ks[0], (16, C), jnp.float32) * s,
        "b_reduce": jax.random.normal(ks[1], (16,), jnp.float32) * s,
        "w_fc1":    jax.random.normal(ks[2], (6, 16), jnp.float32) * s,
        "b_fc1":    jax.random.normal(ks[3], (6,), jnp.float32) * s,
        "w_fc2":    jax.random.normal(ks[4], (3 * C,), jnp.float32) * s,
        "w1":       jax.random.normal(ks[5], (1,), jnp.float32) * s,
        "w3":       jax.random.normal(ks[6], (3,), jnp.float32) * s,
        "w5":       jax.random.normal(ks[7], (5,), jnp.float32) * s,
    }


if __name__ == "__main__":
    key = jax.random.PRNGKey(0)
    kx, kp = jax.random.split(key)
    # C must be 128 because the module hardcodes MHN(128, 3, ...).
    N, C, S, H, W = 2, 128, 4, 4, 4
    x = jax.random.normal(kx, (N, C, S, H, W), jnp.float32)
    params = make_params(kp, C)

    out = jax.block_until_ready(local_attention(x, params))
    ref = jax.block_until_ready(local_attention_ref(x, params))

    assert out.shape == x.shape, (out.shape, x.shape)
    max_err = float(jnp.max(jnp.abs(out - ref)))
    assert jnp.allclose(out, ref, rtol=2e-4, atol=2e-5), max_err
    print("KERNEL_OK")
</pallas_src>

<mosaic_0001>
module attributes {stable_mosaic.version = 11 : i64} {
  func.func @_scale_kernel(%arg0: i32, %arg1: memref<1xf32, #tpu.memory_space<smem>>, %arg2: memref<2x128xf32, #tpu.memory_space<vmem>>, %arg3: memref<128x128xf32, #tpu.memory_space<vmem>>, %arg4: memref<1x128xf32, #tpu.memory_space<vmem>>, %arg5: memref<128x128xf32, #tpu.memory_space<vmem>>, %arg6: memref<1x128xf32, #tpu.memory_space<vmem>>, %arg7: memref<128x384xf32, #tpu.memory_space<vmem>>, %arg8: memref<128x256xf32, #tpu.memory_space<vmem>>, %arg9: memref<2x128xf32, #tpu.memory_space<vmem>>) attributes {dimension_semantics = [#tpu.dimension_semantics<arbitrary>], iteration_bounds = array<i64: 1>, scalar_prefetch = 0 : i64, scratch_operands = 0 : i64, tpu.core_type = #tpu.core_type<tc>, window_params = [{transform_indices = @transform_0, window_bounds = array<i64: 1>}, {pipeline_mode = #tpu.pipeline_mode<synchronous>, transform_indices = @transform_1, window_bounds = array<i64: 2, 128>}, {pipeline_mode = #tpu.pipeline_mode<synchronous>, transform_indices = @transform_2, window_bounds = array<i64: 128, 128>}, {pipeline_mode = #tpu.pipeline_mode<synchronous>, transform_indices = @transform_3, window_bounds = array<i64: 1, 128>}, {pipeline_mode = #tpu.pipeline_mode<synchronous>, transform_indices = @transform_4, window_bounds = array<i64: 128, 128>}, {pipeline_mode = #tpu.pipeline_mode<synchronous>, transform_indices = @transform_5, window_bounds = array<i64: 1, 128>}, {pipeline_mode = #tpu.pipeline_mode<synchronous>, transform_indices = @transform_6, window_bounds = array<i64: 128, 384>}, {pipeline_mode = #tpu.pipeline_mode<synchronous>, transform_indices = @transform_7, window_bounds = array<i64: 128, 256>}, {pipeline_mode = #tpu.pipeline_mode<synchronous>, transform_indices = @transform_8, window_bounds = array<i64: 2, 128>}]} {
    %c0 = arith.constant 0 : index
    %c0_0 = arith.constant 0 : index
    %0 = vector.load %arg2[%c0, %c0_0] : memref<2x128xf32, #tpu.memory_space<vmem>>, vector<2x128xf32>
    %c0_1 = arith.constant 0 : index
    %c0_2 = arith.constant 0 : index
    %1 = vector.load %arg3[%c0_1, %c0_2] : memref<128x128xf32, #tpu.memory_space<vmem>>, vector<128x128xf32>
    %cst = arith.constant dense<0.000000e+00> : vector<2x128xf32>
    %2 = tpu.matmul %0, %1, %cst {dimension_numbers = #tpu.dot_dimension_numbers<[1], [0], [0], [1], [0, 0, 1, 1], [], []>} : vector<2x128xf32>, vector<128x128xf32>, vector<2x128xf32> -> vector<2x128xf32>
    %c0_3 = arith.constant 0 : index
    %c0_4 = arith.constant 0 : index
    %3 = vector.load %arg4[%c0_3, %c0_4] : memref<1x128xf32, #tpu.memory_space<vmem>>, vector<1x128xf32>
    %4 = vector.broadcast %3 : vector<1x128xf32> to vector<2x128xf32>
    %5 = arith.addf %2, %4 : vector<2x128xf32>
    %c0_5 = arith.constant 0 : index
    %c0_6 = arith.constant 0 : index
    %6 = vector.load %arg5[%c0_5, %c0_6] : memref<128x128xf32, #tpu.memory_space<vmem>>, vector<128x128xf32>
    %cst_7 = arith.constant dense<0.000000e+00> : vector<2x128xf32>
    %7 = tpu.matmul %5, %6, %cst_7 {dimension_numbers = #tpu.dot_dimension_numbers<[1], [0], [0], [1], [0, 0, 1, 1], [], []>} : vector<2x128xf32>, vector<128x128xf32>, vector<2x128xf32> -> vector<2x128xf32>
    %c0_8 = arith.constant 0 : index
    %c0_9 = arith.constant 0 : index
    %8 = vector.load %arg6[%c0_8, %c0_9] : memref<1x128xf32, #tpu.memory_space<vmem>>, vector<1x128xf32>
    %9 = vector.broadcast %8 : vector<1x128xf32> to vector<2x128xf32>
    %10 = arith.addf %7, %9 : vector<2x128xf32>
    %11 = arith.negf %10 : vector<2x128xf32>
    %12 = math.exp %11 : vector<2x128xf32>
    %cst_10 = arith.constant 1.000000e+00 : f32
    %13 = vector.broadcast %cst_10 : f32 to vector<2x128xf32>
    %14 = arith.addf %13, %12 : vector<2x128xf32>
    %15 = arith.divf %13, %14 : vector<2x128xf32>
    %16 = tpu.iota {dimensions = array<i32: 1>} : vector<2x128xi32>
    %c6_i32 = arith.constant 6 : i32
    %17 = vector.broadcast %c6_i32 : i32 to vector<2x128xi32>
    %18 = arith.cmpi slt, %16, %17 : vector<2x128xi32>
    %cst_11 = arith.constant 0.000000e+00 : f32
    %19 = vector.broadcast %cst_11 : f32 to vector<2x128xf32>
    %20 = arith.select %18, %15, %19 : vector<2x128xi1>, vector<2x128xf32>
    %c0_12 = arith.constant 0 : index
    %c0_13 = arith.constant 0 : index
    %21 = vector.load %arg7[%c0_12, %c0_13] : memref<128x384xf32, #tpu.memory_space<vmem>>, vector<128x384xf32>
    %cst_14 = arith.constant dense<0.000000e+00> : vector<2x384xf32>
    %22 = tpu.matmul %20, %21, %cst_14 {dimension_numbers = #tpu.dot_dimension_numbers<[1], [0], [0], [1], [0, 0, 1, 1], [], []>} : vector<2x128xf32>, vector<128x384xf32>, vector<2x384xf32> -> vector<2x384xf32>
    %23 = vector.extract_strided_slice %22 {offsets = [0, 0], sizes = [2, 128], strides = [1, 1]} : vector<2x384xf32> to vector<2x128xf32>
    %24 = arith.mulf %23, %0 : vector<2x128xf32>
    %cst_15 = arith.constant dense<0.000000e+00> : vector<2xf32>
    %25 = vector.multi_reduction <add>, %24, %cst_15 [1] : vector<2x128xf32> to vector<2xf32>
    %26 = vector.shape_cast %25 : vector<2xf32> to vector<2x1xf32>
    %27 = vector.extract_strided_slice %22 {offsets = [0, 128], sizes = [2, 128], strides = [1, 1]} : vector<2x384xf32> to vector<2x128xf32>
    %28 = arith.mulf %27, %0 : vector<2x128xf32>
    %cst_16 = arith.constant dense<0.000000e+00> : vector<2xf32>
    %29 = vector.multi_reduction <add>, %28, %cst_16 [1] : vector<2x128xf32> to vector<2xf32>
    %30 = vector.shape_cast %29 : vector<2xf32> to vector<2x1xf32>
    %31 = vector.extract_strided_slice %22 {offsets = [0, 256], sizes = [2, 128], strides = [1, 1]} : vector<2x384xf32> to vector<2x128xf32>
    %32 = arith.mulf %31, %0 : vector<2x128xf32>
    %cst_17 = arith.constant dense<0.000000e+00> : vector<2xf32>
    %33 = vector.multi_reduction <add>, %32, %cst_17 [1] : vector<2x128xf32> to vector<2xf32>
    %34 = vector.shape_cast %33 : vector<2xf32> to vector<2x1xf32>
    %c0_18 = arith.constant 0 : index
    %35 = memref.load %arg1[%c0_18] : memref<1xf32, #tpu.memory_space<smem>>
    %36 = vector.broadcast %35 : f32 to vector<2x128xf32>
    %37 = arith.mulf %0, %36 : vector<2x128xf32>
    %38 = arith.negf %37 : vector<2x128xf32>
    %39 = math.exp %38 : vector<2x128xf32>
    %cst_19 = arith.constant 1.000000e+00 : f32
    %40 = vector.broadcast %cst_19 : f32 to vector<2x128xf32>
    %41 = arith.addf %40, %39 : vector<2x128xf32>
    %42 = arith.divf %40, %41 : vector<2x128xf32>
    %c0_20 = arith.constant 0 : index
    %c0_21 = arith.constant 0 : index
    %43 = vector.load %arg8[%c0_20, %c0_21] : memref<128x256xf32, #tpu.memory_space<vmem>>, vector<128x256xf32>
    %cst_22 = arith.constant dense<0.000000e+00> : vector<2x256xf32>
    %44 = tpu.matmul %0, %43, %cst_22 {dimension_numbers = #tpu.dot_dimension_numbers<[1], [0], [0], [1], [0, 0, 1, 1], [], []>} : vector<2x128xf32>, vector<128x256xf32>, vector<2x256xf32> -> vector<2x256xf32>
    %45 = vector.extract_strided_slice %44 {offsets = [0, 0], sizes = [2, 128], strides = [1, 1]} : vector<2x256xf32> to vector<2x128xf32>
    %46 = arith.negf %45 : vector<2x128xf32>
    %47 = math.exp %46 : vector<2x128xf32>
    %cst_23 = arith.constant 1.000000e+00 : f32
    %48 = vector.broadcast %cst_23 : f32 to vector<2x128xf32>
    %49 = arith.addf %48, %47 : vector<2x128xf32>
    %50 = arith.divf %48, %49 : vector<2x128xf32>
    %51 = vector.extract_strided_slice %44 {offsets = [0, 128], sizes = [2, 128], strides = [1, 1]} : vector<2x256xf32> to vector<2x128xf32>
    %52 = arith.negf %51 : vector<2x128xf32>
    %53 = math.exp %52 : vector<2x128xf32>
    %cst_24 = arith.constant 1.000000e+00 : f32
    %54 = vector.broadcast %cst_24 : f32 to vector<2x128xf32>
    %55 = arith.addf %54, %53 : vector<2x128xf32>
    %56 = arith.divf %54, %55 : vector<2x128xf32>
    %57 = vector.broadcast %26 : vector<2x1xf32> to vector<2x128xf32>
    %58 = arith.mulf %42, %57 : vector<2x128xf32>
    %59 = vector.broadcast %30 : vector<2x1xf32> to vector<2x128xf32>
    %60 = arith.mulf %56, %59 : vector<2x128xf32>
    %61 = arith.addf %58, %60 : vector<2x128xf32>
    %62 = vector.broadcast %34 : vector<2x1xf32> to vector<2x128xf32>
    %63 = arith.mulf %50, %62 : vector<2x128xf32>
    %64 = arith.addf %61, %63 : vector<2x128xf32>
    %c0_25 = arith.constant 0 : index
    %c0_26 = arith.constant 0 : index
    %65 = vector.load %arg9[%c0_25, %c0_26] : memref<2x128xf32, #tpu.memory_space<vmem>>, vector<2x128xf32>
    tpu.vector_store %arg9[%c0_25, %c0_26], %64 {strides = array<i32>} : memref<2x128xf32, #tpu.memory_space<vmem>>, vector<2x128xf32>,
    return
  }
  func.func @transform_0(%arg0: i32) -> i32 {
    %c0_i32 = arith.constant 0 : i32
    %c0_i32_0 = arith.constant 0 : i32
    return %c0_i32 : i32
  }
  func.func @transform_1(%arg0: i32) -> (i32, i32) {
    %c0_i32 = arith.constant 0 : i32
    %c0_i32_0 = arith.constant 0 : i32
    %c0_i32_1 = arith.constant 0 : i32
    return %c0_i32, %c0_i32_0 : i32, i32
  }
  func.func @transform_2(%arg0: i32) -> (i32, i32) {
    %c0_i32 = arith.constant 0 : i32
    %c0_i32_0 = arith.constant 0 : i32
    %c0_i32_1 = arith.constant 0 : i32
    return %c0_i32, %c0_i32_0 : i32, i32
  }
  func.func @transform_3(%arg0: i32) -> (i32, i32) {
    %c0_i32 = arith.constant 0 : i32
    %c0_i32_0 = arith.constant 0 : i32
    %c0_i32_1 = arith.constant 0 : i32
    return %c0_i32, %c0_i32_0 : i32, i32
  }
  func.func @transform_4(%arg0: i32) -> (i32, i32) {
    %c0_i32 = arith.constant 0 : i32
    %c0_i32_0 = arith.constant 0 : i32
    %c0_i32_1 = arith.constant 0 : i32
    return %c0_i32, %c0_i32_0 : i32, i32
  }
  func.func @transform_5(%arg0: i32) -> (i32, i32) {
    %c0_i32 = arith.constant 0 : i32
    %c0_i32_0 = arith.constant 0 : i32
    %c0_i32_1 = arith.constant 0 : i32
    return %c0_i32, %c0_i32_0 : i32, i32
  }
  func.func @transform_6(%arg0: i32) -> (i32, i32) {
    %c0_i32 = arith.constant 0 : i32
    %c0_i32_0 = arith.constant 0 : i32
    %c0_i32_1 = arith.constant 0 : i32
    return %c0_i32, %c0_i32_0 : i32, i32
  }
  func.func @transform_7(%arg0: i32) -> (i32, i32) {
    %c0_i32 = arith.constant 0 : i32
    %c0_i32_0 = arith.constant 0 : i32
    %c0_i32_1 = arith.constant 0 : i32
    return %c0_i32, %c0_i32_0 : i32, i32
  }
  func.func @transform_8(%arg0: i32) -> (i32, i32) {
    %c0_i32 = arith.constant 0 : i32
    %c0_i32_0 = arith.constant 0 : i32
    %c0_i32_1 = arith.constant 0 : i32
    return %c0_i32, %c0_i32_0 : i32, i32
  }
}

</mosaic_0001>

<bundles_post_ra>
// kernel: tpu_custom_call.1
= control target key start
LH: loop header
LB: loop body
LE: loop exit
PB: predicated region body
PF: predicated region fallthrough
CT: control target
= control target key end

     0   :  { %14 = vsyncpa [#allocation4], 0  ;;  %s1258_s0 = inlined_call_operand.<no memory space> [shape: f32[1], index: 0, kind: input, shape index: {}]   ;;  %s1259_s1 = inlined_call_operand.vmem [shape: f32[2,128], index: 1, kind: input, shape index: {}]   ;;  %s1260_s2 = inlined_call_operand.hbm [shape: f32[128,128], index: 2, kind: input, shape index: {}]   ;;  %s1261_s3 = inlined_call_operand.vmem [shape: f32[1,128], index: 3, kind: input, shape index: {}]   ;;  %s1262_s4 = inlined_call_operand.hbm [shape: f32[128,128], index: 4, kind: input, shape index: {}]   ;;  %s1263_s5 = inlined_call_operand.vmem [shape: f32[1,128], index: 5, kind: input, shape index: {}]   ;;  %s1264_s6 = inlined_call_operand.hbm [shape: f32[128,384], index: 6, kind: input, shape index: {}]   ;;  %s1265_s7 = inlined_call_operand.hbm [shape: f32[128,256], index: 7, kind: input, shape index: {}]   ;;  %s1266_s8 = inlined_call_operand.hbm [shape: f32[2,128], index: 8, kind: output, shape index: {}]  }
   0x1   :  { %15 = vsyncpa [#allocation7], 0 }
   0x2   :  { %16 = vsyncpa [#allocation10], 0 }
   0x3   :  { %17 = vsyncpa [#allocation5], 0  ;;  %s1080_s27 = smov [#allocation6]   ;;  %s1081_s29 = smov [#allocation3]  }
   0x4   :  { %s41_s28 = sshll.u32 %s1080_s27, 4  ;;  %s27_s30 = sshll.u32 %s1081_s29, 4  ;;  %s42_s28 = int_to_ptr.vmem [resolvable:$true] %s41_s28  ;;  %s1139_s30 = int_to_ptr.vmem [resolvable:$true] %s27_s30 }
   0x5   :  { %s962_s11 = scalar_lea.hbm %s1262_s4, 2048 }
   0x6   :  { %p963_p0 = scmp.ne.s32.totalorder %s1262_s4, %s962_s11  ;;  %p966_p1 = scmp.lt.u32.totalorder %s962_s11, %s1262_s4 }
   0x8   :  { %p968_p2 = pnand %p966_p1, %p963_p0 }
   0xa   :  { %971 = shalt.err (!%p968_p2)
}
   0xb   :  { %s972_s16 = scalar_lea.vmem %s42_s28, 2048  ;;  %p977_p4 = scmp.lt.s32.totalorder %s42_s28, %s42_s28 }
   0xc   :  { %p973_p3 = scmp.ne.s32.totalorder %s42_s28, %s972_s16  ;;  %p978_p5 = scmp.lt.s32.totalorder %s972_s16, %s972_s16 }
   0xe   :  { %p979_p6 = por %p978_p5, %p977_p4 }
  0x10   :  { %p980_p7 = pnand %p979_p6, %p973_p3 }
  0x12   :  { %983 = shalt.err (!%p980_p7)
}
  0x13   :  { %s1082_s17 = smov 128   ;;  %s1083_s18 = smov 8  }
  0x14   :  { %47 = dma.hbm_to_vmem [thread:$0]  %s1262_s4, 2048, %s42_s28, [#allocation7], %s1082_s17, %s1082_s17, %s1083_s18  }
  0x15   :  { %s984_s23 = scalar_lea.hbm %s1260_s2, 2048 }
  0x16   :  { %p985_p8 = scmp.ne.s32.totalorder %s1260_s2, %s984_s23  ;;  %p988_p9 = scmp.lt.u32.totalorder %s984_s23, %s1260_s2 }
  0x18   :  { %p990_p10 = pnand %p988_p9, %p985_p8 }
  0x1a   :  { %993 = shalt.err (!%p990_p10)
}
  0x1b   :  { %s994_s29 = scalar_lea.vmem %s1139_s30, 2048  ;;  %p999_p12 = scmp.lt.s32.totalorder %s1139_s30, %s1139_s30 }
  0x1c   :  { %p995_p11 = scmp.ne.s32.totalorder %s1139_s30, %s994_s29  ;;  %p1000_p13 = scmp.lt.s32.totalorder %s994_s29, %s994_s29 }
  0x1e   :  { %p1001_p0 = por %p1000_p13, %p999_p12 }
  0x20   :  { %p1002_p1 = pnand %p1001_p0, %p995_p11 }
  0x22   :  { %1005 = shalt.err (!%p1002_p1)
}
  0x23   :  { %33 = dma.hbm_to_vmem [thread:$0]  %s1260_s2, 2048, %s1139_s30, [#allocation4], %s1082_s17, %s1082_s17, %s1083_s18  }
  0x24   :  { %s1084_s9 = smov [#allocation8]   ;;  %s1006_s13 = scalar_lea.hbm %s1264_s6, 6144 }
  0x25   :  { %s55_s10 = sshll.u32 %s1084_s9, 4  ;;  %p1007_p2 = scmp.ne.s32.totalorder %s1264_s6, %s1006_s13  ;;  %s56_s10 = int_to_ptr.vmem [resolvable:$true] %s55_s10 }
  0x26   :  { %p1010_p3 = scmp.lt.u32.totalorder %s1006_s13, %s1264_s6 }
  0x28   :  { %p1012_p4 = pnand %p1010_p3, %p1007_p2 }
  0x2a   :  { %1015 = shalt.err (!%p1012_p4)
}
  0x2b   :  { %s1016_s20 = scalar_lea.vmem %s56_s10, 6144  ;;  %p1021_p6 = scmp.lt.s32.totalorder %s56_s10, %s56_s10 }
  0x2c   :  { %p1017_p5 = scmp.ne.s32.totalorder %s56_s10, %s1016_s20  ;;  %p1022_p7 = scmp.lt.s32.totalorder %s1016_s20, %s1016_s20 }
  0x2e   :  { %p1023_p8 = por %p1022_p7, %p1021_p6 }
  0x30   :  { %p1024_p9 = pnand %p1023_p8, %p1017_p5 }
  0x32   :  { %1027 = shalt.err (!%p1024_p9)
}
  0x33   :  { %s1085_s2 = smov 384   ;;  %s1086_s30 = smov 24  }
  0x34   :  { %61 = dma.hbm_to_vmem [thread:$0]  %s1264_s6, 6144, %s56_s10, [#allocation7], %s1085_s2, %s1085_s2, %s1086_s30  }
  0x35   :  { %s1087_s21 = smov [#allocation9]   ;;  %s1028_s25 = scalar_lea.hbm %s1265_s7, 4096 }
  0x36   :  { %s67_s22 = sshll.u32 %s1087_s21, 4  ;;  %p1029_p10 = scmp.ne.s32.totalorder %s1265_s7, %s1028_s25  ;;  %s68_s22 = int_to_ptr.vmem [resolvable:$true] %s67_s22 }
  0x37   :  { %p1032_p11 = scmp.lt.u32.totalorder %s1028_s25, %s1265_s7 }
  0x39   :  { %p1034_p12 = pnand %p1032_p11, %p1029_p10 }
  0x3b   :  { %1037 = shalt.err (!%p1034_p12)
}
  0x3c   :  { %s1038_s28 = scalar_lea.vmem %s68_s22, 4096  ;;  %p1043_p0 = scmp.lt.s32.totalorder %s68_s22, %s68_s22 }
  0x3d   :  { %p1039_p13 = scmp.ne.s32.totalorder %s68_s22, %s1038_s28  ;;  %p1044_p1 = scmp.lt.s32.totalorder %s1038_s28, %s1038_s28 }
  0x3f   :  { %p1045_p2 = por %p1044_p1, %p1043_p0 }
  0x41   :  { %p1046_p3 = pnand %p1045_p2, %p1039_p13 }
  0x43   :  { %1049 = shalt.err (!%p1046_p3)
}
  0x44   :  { %s1088_s6 = smov 256   ;;  %s1089_s9 = smov 16  }
  0x45   :  { %73 = dma.hbm_to_vmem [thread:$0]  %s1265_s7, 4096, %s68_s22, [#allocation10], %s1088_s6, %s1088_s6, %s1089_s9  }
  0x46   :  { %1072 = dma.done.wait [#allocation4], 2048  }
  0x47   :  { %1073 = vsyncadd [#allocation4], 4294965248 }
  0x48   :  { %1074 = dma.done.wait [#allocation7], 8192  }
  0x49   :  { %1075 = vsyncadd [#allocation7], 4294959104 }
  0x4a   :  { %1076 = dma.done.wait [#allocation10], 4096  }
  0x4b   :  { %1077 = vsyncadd [#allocation10], 4294963200  ;;  %v1090_v0 = vmov 0.0|0.0   ;;  %vm1091_vm0 = vmmov 0   ;;  %v1092_v1 = vmov 0.0   ;;  %v87_v2 = vld [vmem:[#allocation3] sm:$0xff] }
  0x4c   :  { %796 = vmatprep.subr.bf16.mxu0 %v1090_v0  ;;  %723 = vmatprep.mubr.msk.f32.mxu0 %vm1091_vm0, %v1092_v1  ;;  %v88_v3 = vld [vmem:[#allocation3 + $0x8] sm:$0xff]  ;;  %v89_v4 = vld [vmem:[#allocation3 + $0x10] sm:$0xff]  ;;  %v90_v6 = vld [vmem:[#allocation3 + $0x18] sm:$0xff]  ;;  %vm473_vm2 = vcmask 1041408  }
  0x4d   :  { %820 = vmatprep.subr.bf16.mxu1 %v1090_v0  ;;  %758 = vmatprep.mubr.msk.f32.mxu1 %vm1091_vm0, %v1092_v1  ;;  %v797_v5 = vpack.c.bf16 %v88_v3, %v87_v2  ;;  %v800_v7 = vpack.c.bf16 %v90_v6, %v89_v4  ;;  %v91_v8 = vld [vmem:[#allocation3 + $0x20] sm:$0xff]  ;;  %v92_v9 = vld [vmem:[#allocation3 + $0x28] sm:$0xff]  ;;  %v182_v12 = vld [vmem:[#allocation6 + $0x10] sm:$0xff] }
  0x4e   :  { %v180_v10 = vld [vmem:[#allocation6] sm:$0xff]  ;;  %v181_v11 = vld [vmem:[#allocation6 + $0x8] sm:$0xff]  ;;  %v183_v13 = vld [vmem:[#allocation6 + $0x18] sm:$0xff]  ;;  %v803_v14 = vpack.c.bf16 %v92_v9, %v91_v8 }
  0x4f   :  { %798 = vmatpush3.bf16.msra.mxu0 %v797_v5  ;;  %v821_v15 = vpack.c.bf16 %v181_v11, %v180_v10  ;;  %v93_v16 = vld [vmem:[#allocation3 + $0x30] sm:$0xff]  ;;  %v94_v17 = vld [vmem:[#allocation3 + $0x38] sm:$0xff]  ;;  %v824_v18 = vpack.c.bf16 %v183_v13, %v182_v12  ;;  %v184_v19 = vld [vmem:[#allocation6 + $0x20] sm:$0xff] }
  0x50   :  { %799 = vmatprep.subr.bf16.mxu0 %v1090_v0  ;;  %v185_v20 = vld [vmem:[#allocation6 + $0x28] sm:$0xff]  ;;  %v806_v21 = vpack.c.bf16 %v94_v17, %v93_v16  ;;  %v95_v22 = vld [vmem:[#allocation3 + $0x40] sm:$0xff]  ;;  %v186_v25 = vld [vmem:[#allocation6 + $0x30] sm:$0xff] }
  0x51   :  { %822 = vmatpush3.bf16.msra.mxu1 %v821_v15  ;;  %v96_v23 = vld [vmem:[#allocation3 + $0x48] sm:$0xff]  ;;  %v827_v24 = vpack.c.bf16 %v185_v20, %v184_v19  ;;  %v187_v26 = vld [vmem:[#allocation6 + $0x38] sm:$0xff]  ;;  %v97_v28 = vld [vmem:[#allocation3 + $0x50] sm:$0xff] }
  0x52   :  { %823 = vmatprep.subr.bf16.mxu1 %v1090_v0  ;;  %v809_v27 = vpack.c.bf16 %v96_v23, %v95_v22  ;;  %v98_v29 = vld [vmem:[#allocation3 + $0x58] sm:$0xff]  ;;  %v830_v30 = vpack.c.bf16 %v187_v26, %v186_v25  ;;  %v188_v31 = vld [vmem:[#allocation6 + $0x40] sm:$0xff]  ;;  %v189_v32 = vld [vmem:[#allocation6 + $0x48] sm:$0xff] }
  0x53   :  { %801 = vmatpush3.bf16.msra.mxu0 %v800_v7  ;;  %v812_v33 = vpack.c.bf16 %v98_v29, %v97_v28  ;;  %v99_v34 = vld [vmem:[#allocation3 + $0x60] sm:$0xff]  ;;  %v100_v35 = vld [vmem:[#allocation3 + $0x68] sm:$0xff]  ;;  %v833_v36 = vpack.c.bf16 %v189_v32, %v188_v31  ;;  %v190_v37 = vld [vmem:[#allocation6 + $0x50] sm:$0xff] }
  0x54   :  { %802 = vmatprep.subr.bf16.mxu0 %v1090_v0  ;;  %v191_v38 = vld [vmem:[#allocation6 + $0x58] sm:$0xff]  ;;  %v815_v39 = vpack.c.bf16 %v100_v35, %v99_v34  ;;  %v101_v40 = vld [vmem:[#allocation3 + $0x70] sm:$0xff]  ;;  %v192_v43 = vld [vmem:[#allocation6 + $0x60] sm:$0xff] }
  0x55   :  { %825 = vmatpush3.bf16.msra.mxu1 %v824_v18  ;;  %v102_v41 = vld [vmem:[#allocation3 + $0x78] sm:$0xff]  ;;  %v836_v42 = vpack.c.bf16 %v191_v38, %v190_v37  ;;  %v193_v44 = vld [vmem:[#allocation6 + $0x68] sm:$0xff]  ;;  %v1216_v47 = vld [vmem:[%s1259_s1] sm:$0x3] }
  0x56   :  { %826 = vmatprep.subr.bf16.mxu1 %v1090_v0  ;;  %v818_v45 = vpack.c.bf16 %v102_v41, %v101_v40  ;;  %v839_v46 = vpack.c.bf16 %v193_v44, %v192_v43  ;;  %v194_v48 = vld [vmem:[#allocation6 + $0x70] sm:$0xff]  ;;  %v195_v49 = vld [vmem:[#allocation6 + $0x78] sm:$0xff]  ;;  %v284_v51 = vld [vmem:[#allocation8 + $0x8] sm:$0xff] }
  0x57   :  { %804 = vmatpush3.bf16.msra.mxu0 %v803_v14  ;;  %v842_v50 = vpack.c.bf16 %v195_v49, %v194_v48  ;;  %v287_v52 = vld [vmem:[#allocation8 + $0x20] sm:$0xff]  ;;  %v286_v55 = vld [vmem:[#allocation8 + $0x18] sm:$0xff]  ;;  %v285_v57 = vld [vmem:[#allocation8 + $0x10] sm:$0xff] }
  0x58   :  { %805 = vmatprep.subr.bf16.mxu0 %v1090_v0  ;;  %v283_v53 = vld [vmem:[#allocation8] sm:$0xff]  ;;  %v844_v54 = vpack.c.bf16 %v287_v52, %v284_v51  ;;  %v288_v58 = vld [vmem:[#allocation8 + $0x28] sm:$0xff]  ;;  %v290_v2 = vld [vmem:[#allocation8 + $0x38] sm:$0xff] }
  0x59   :  { %828 = vmatpush3.bf16.msra.mxu1 %v827_v24  ;;  %v846_v56 = vpack.c.bf16 %v286_v55, %v283_v53  ;;  %v632_v59 = vld [vmem:[%s1261_s3] ss:$0 sm:$0xff]  ;;  %v877_v61 = vpack.c.bf16 %v288_v58, %v285_v57  ;;  %v293_v3 = vld [vmem:[#allocation8 + $0x50] sm:$0xff]  ;;  %v292_v6 = vld [vmem:[#allocation8 + $0x48] sm:$0xff] }
  0x5a   :  { %829 = vmatprep.subr.bf16.mxu1 %v1090_v0  ;;  %v848_v4 = vpack.c.bf16 %v293_v3, %v290_v2  ;;  %v289_v5 = vld [vmem:[#allocation8 + $0x30] sm:$0xff]  ;;  %v291_v7 = vld [vmem:[#allocation8 + $0x40] sm:$0xff]  ;;  %v294_v9 = vld [vmem:[#allocation8 + $0x58] sm:$0xff] }
  0x5b   :  { %807 = vmatpush3.bf16.msra.mxu0 %v806_v21  ;;  %v850_v8 = vpack.c.bf16 %v292_v6, %v289_v5  ;;  %v880_v10 = vpack.c.bf16 %v294_v9, %v291_v7  ;;  %v296_v11 = vld [vmem:[#allocation8 + $0x68] sm:$0xff]  ;;  %v299_v12 = vld [vmem:[#allocation8 + $0x80] sm:$0xff]  ;;  %v298_v15 = vld [vmem:[#allocation8 + $0x78] sm:$0xff] }
  0x5c   :  { %808 = vmatprep.subr.bf16.mxu0 %v1090_v0  ;;  %v852_v13 = vpack.c.bf16 %v299_v12, %v296_v11  ;;  %v295_v14 = vld [vmem:[#allocation8 + $0x60] sm:$0xff]  ;;  %v297_v16 = vld [vmem:[#allocation8 + $0x70] sm:$0xff]  ;;  %v300_v18 = vld [vmem:[#allocation8 + $0x88] sm:$0xff] }
  0x5d   :  { %831 = vmatpush3.bf16.msra.mxu1 %v830_v30  ;;  %v854_v17 = vpack.c.bf16 %v298_v15, %v295_v14  ;;  %v883_v19 = vpack.c.bf16 %v300_v18, %v297_v16  ;;  %v302_v20 = vld [vmem:[#allocation8 + $0x98] sm:$0xff]  ;;  %v305_v21 = vld [vmem:[#allocation8 + $0xb0] sm:$0xff]  ;;  %v304_v24 = vld [vmem:[#allocation8 + $0xa8] sm:$0xff]  ;;  %v279_v14 = vlaneseq }
  0x5e   :  { %832 = vmatprep.subr.bf16.mxu1 %v1090_v0  ;;  %v856_v22 = vpack.c.bf16 %v305_v21, %v302_v20  ;;  %v301_v23 = vld [vmem:[#allocation8 + $0x90] sm:$0xff]  ;;  %v303_v25 = vld [vmem:[#allocation8 + $0xa0] sm:$0xff]  ;;  %v308_v29 = vld [vmem:[#allocation8 + $0xc8] sm:$0xff] }
  0x5f   :  { %810 = vmatpush3.bf16.msra.mxu0 %v809_v27  ;;  %v858_v26 = vpack.c.bf16 %v304_v24, %v301_v23  ;;  %v306_v27 = vld [vmem:[#allocation8 + $0xb8] sm:$0xff]  ;;  %v311_v30 = vld [vmem:[#allocation8 + $0xe0] sm:$0xff]  ;;  %v309_v34 = vld [vmem:[#allocation8 + $0xd0] sm:$0xff] }
  0x60   :  { %811 = vmatprep.subr.bf16.mxu0 %v1090_v0  ;;  %v886_v28 = vpack.c.bf16 %v306_v27, %v303_v25  ;;  %v860_v31 = vpack.c.bf16 %v311_v30, %v308_v29  ;;  %v307_v32 = vld [vmem:[#allocation8 + $0xc0] sm:$0xff]  ;;  %v314_v38 = vld [vmem:[#allocation8 + $0xf8] sm:$0xff]  ;;  %v313_v41 = vld [vmem:[#allocation8 + $0xf0] sm:$0xff] }
  0x61   :  { %834 = vmatpush3.bf16.msra.mxu1 %v833_v36  ;;  %v312_v36 = vld [vmem:[#allocation8 + $0xe8] sm:$0xff]  ;;  %v315_v43 = vld [vmem:[#allocation8 + $0x100] sm:$0xff]  ;;  %v322_v52 = vld [vmem:[#allocation8 + $0x138] sm:$0xff] }
  0x62   :  { %835 = vmatprep.subr.bf16.mxu1 %v1090_v0  ;;  %v889_v37 = vpack.c.bf16 %v312_v36, %v309_v34  ;;  %v320_v48 = vld [vmem:[#allocation8 + $0x128] sm:$0xff]  ;;  %v323_v49 = vld [vmem:[#allocation8 + $0x140] sm:$0xff]  ;;  %v321_v53 = vld [vmem:[#allocation8 + $0x130] sm:$0xff] }
  0x63   :  { %813 = vmatpush3.bf16.msra.mxu0 %v812_v33  ;;  %v310_v33 = vld [vmem:[#allocation8 + $0xd8] sm:$0xff]  ;;  %v868_v51 = vpack.c.bf16 %v323_v49, %v320_v48  ;;  %v329_v58 = vld [vmem:[#allocation8 + $0x170] sm:$0xff]  ;;  %v633_v7 = vld [vmem:[%s1263_s5] ss:$0 sm:$0xff] }
  0x64   :  { %814 = vmatprep.subr.bf16.mxu0 %v1090_v0  ;;  %v862_v35 = vpack.c.bf16 %v310_v33, %v307_v32  ;;  %v326_v57 = vld [vmem:[#allocation8 + $0x158] sm:$0xff]  ;;  %v494_v15 = vld [vmem:[#allocation9] sm:$0xff]  ;;  %v496_v16 = vld [vmem:[#allocation9 + $0x10] sm:$0xff] }
  0x65   :  { %837 = vmatpush3.bf16.msra.mxu1 %v836_v42  ;;  %v316_v42 = vld [vmem:[#allocation8 + $0x108] sm:$0xff]  ;;  %v497_v5 = vld [vmem:[#allocation9 + $0x18] sm:$0xff]  ;;  %v498_v21 = vld [vmem:[#allocation9 + $0x20] sm:$0xff] }
  0x66   :  { %838 = vmatprep.subr.bf16.mxu1 %v1090_v0  ;;  %v866_v44 = vpack.c.bf16 %v316_v42, %v313_v41  ;;  %v501_v18 = vld [vmem:[#allocation9 + $0x38] sm:$0xff]  ;;  %v503_v24 = vld [vmem:[#allocation9 + $0x48] sm:$0xff]  ;;  %v504_v29 = vld [vmem:[#allocation9 + $0x50] sm:$0xff] }
  0x67   :  { %816 = vmatpush3.bf16.msra.mxu0 %v815_v39  ;;  %v317_v39 = vld [vmem:[#allocation8 + $0x110] sm:$0xff]  ;;  %v505_v25 = vld [vmem:[#allocation9 + $0x58] sm:$0xff]  ;;  %v507_v30 = vld [vmem:[#allocation9 + $0x68] sm:$0xff] }
  0x68   :  { %817 = vmatprep.subr.bf16.mxu0 %v1090_v0  ;;  %v864_v40 = vpack.c.bf16 %v317_v39, %v314_v38  ;;  %v908_v27 = vpack.c.bf16 %v505_v25, %v503_v24  ;;  %v506_v34 = vld [vmem:[#allocation9 + $0x60] sm:$0xff]  ;;  %v511_v36 = vld [vmem:[#allocation9 + $0x88] sm:$0xff]  ;;  %v517_v42 = vld [vmem:[#allocation9 + $0xb8] sm:$0xff] }
  0x69   :  { %840 = vmatpush3.bf16.msra.mxu1 %v839_v46  ;;  %v515_v41 = vld [vmem:[#allocation9 + $0xa8] sm:$0xff]  ;;  %v521_v49 = vld [vmem:[#allocation9 + $0xd8] sm:$0xff] }
  0x6a   :  { %841 = vmatprep.subr.bf16.mxu1 %v1090_v0  ;;  %v519_v48 = vld [vmem:[#allocation9 + $0xc8] sm:$0xff] }
  0x6b   :  { %819 = vmatpush3.bf16.msra.mxu0 %v818_v45  ;;  %v318_v45 = vld [vmem:[#allocation8 + $0x118] sm:$0xff] }
  0x6c   :  { %845 = vmatprep.subr.bf16.mxu0 %v844_v54  ;;  %v892_v46 = vpack.c.bf16 %v318_v45, %v315_v43  ;;  %v324_v54 = vld [vmem:[#allocation8 + $0x148] sm:$0xff]  ;;  %v514_v45 = vld [vmem:[#allocation9 + $0xa0] sm:$0xff] }
  0x6d   :  { %843 = vmatpush3.bf16.msra.mxu1 %v842_v50  ;;  %v319_v50 = vld [vmem:[#allocation8 + $0x120] sm:$0xff] }
  0x6e   :  { %724 = vmatmul.mubr.f32.vlgmr.msra.gmra.mrb[0].mxu0 %v1216_v47  ;;  %876 = vmatprep.subr.bf16.mxu1 %v1090_v0  ;;  %v870_v55 = vpack.c.bf16 %v322_v52, %v319_v50  ;;  %v518_v52 = vld [vmem:[#allocation9 + $0xc0] sm:$0xff] }
  0x6f   :  { %395 = vmatprep.mubr.f32.mxu0 %v1092_v1  ;;  %847 = vmatpush1.bf16.msra.mxu0 %v846_v56  ;;  %v895_v56 = vpack.c.bf16 %v324_v54, %v321_v53  ;;  %v520_v53 = vld [vmem:[#allocation9 + $0xd0] sm:$0xff]  ;;  %v523_v54 = vld [vmem:[#allocation9 + $0xe8] sm:$0xff] }
  0x70   :  { %849 = vmatprep.subr.bf16.mxu0 %v848_v4  ;;  %v495_v4 = vld [vmem:[#allocation9 + $0x8] sm:$0xff] }
  0x71   :  { %v900_v6 = vpack.c.bf16 %v497_v5, %v495_v4 }
  0x73   :  { %851 = vmatpush1.bf16.msra.mxu0 %v850_v8 }
  0x74   :  { %853 = vmatprep.subr.bf16.mxu0 %v852_v13 }
  0x77   :  { %855 = vmatpush1.bf16.msra.mxu0 %v854_v17  ;;  %v499_v17 = vld [vmem:[#allocation9 + $0x28] sm:$0xff] }
  0x78   :  { %857 = vmatprep.subr.bf16.mxu0 %v856_v22  ;;  %v904_v20 = vpack.c.bf16 %v501_v18, %v499_v17  ;;  %v500_v22 = vld [vmem:[#allocation9 + $0x30] sm:$0xff] }
  0x7b   :  { %859 = vmatpush1.bf16.msra.mxu0 %v858_v26  ;;  %v906_v26 = vpack.c.bf16 %v500_v22, %v498_v21 }
  0x7c   :  { %861 = vmatprep.subr.bf16.mxu0 %v860_v31  ;;  %v509_v31 = vld [vmem:[#allocation9 + $0x78] sm:$0xff] }
  0x7d   :  { %v912_v33 = vpack.c.bf16 %v509_v31, %v507_v30 }
  0x7f   :  { %863 = vmatpush1.bf16.msra.mxu0 %v862_v35  ;;  %v508_v35 = vld [vmem:[#allocation9 + $0x70] sm:$0xff] }
  0x80   :  { %865 = vmatprep.subr.bf16.mxu0 %v864_v40  ;;  %v914_v38 = vpack.c.bf16 %v508_v35, %v506_v34  ;;  %v510_v40 = vld [vmem:[#allocation9 + $0x80] sm:$0xff] }
  0x83   :  { %867 = vmatpush1.bf16.msra.mxu0 %v866_v44  ;;  %v920_v44 = vpack.c.bf16 %v517_v42, %v515_v41 }
  0x84   :  { %869 = vmatprep.subr.bf16.mxu0 %v868_v51  ;;  %v924_v51 = vpack.c.bf16 %v521_v49, %v519_v48 }
  0x87   :  { %871 = vmatpush1.bf16.msra.mxu0 %v870_v55  ;;  %v525_v55 = vld [vmem:[#allocation9 + $0xf8] sm:$0xff] }
 0x141   :  { %v176_v60 = vpop.f32.mrb[0].mxu0 }
 0x142   :  { %v177_v62 = vadd.f32 %v632_v59, %v176_v60  ;;  %v725_v63 = vpop.f32.mrb[1].mxu0  ;;  %v325_v59 = vld [vmem:[#allocation8 + $0x150] sm:$0xff]  ;;  %v872_v60 = vpack.c.bf16 %v329_v58, %v326_v57  ;;  %v928_v57 = vpack.c.bf16 %v525_v55, %v523_v54  ;;  %v522_v58 = vld [vmem:[#allocation9 + $0xe0] sm:$0xff] }
 0x143   :  { %v330_v63 = vld [vmem:[#allocation8 + $0x178] sm:$0xff] }
 0x144   :  { %759 = vmatmul.mubr.f32.vlgmr.msra.gmra.mrb[0].mxu1 %v177_v62  ;;  %v327_v62 = vld [vmem:[#allocation8 + $0x160] sm:$0xff]  ;;  %873 = vmatprep.subr.bf16.mxu0 %v872_v60 }
 0x145   :  { %878 = vmatpush3.bf16.msra.mxu1 %v877_v61  ;;  %793 = vmatprep.mubr.msk.f32.mxu1 %vm1091_vm0, %v1092_v1  ;;  %v328_v61 = vld [vmem:[#allocation8 + $0x168] sm:$0xff]  ;;  %v898_v3 = vpack.c.bf16 %v330_v63, %v327_v62 }
 0x146   :  { %879 = vmatprep.subr.bf16.mxu1 %v1090_v0  ;;  %v874_v2 = vpack.c.bf16 %v328_v61, %v325_v59  ;;  %v524_v59 = vld [vmem:[#allocation9 + $0xf0] sm:$0xff] }
 0x147   :  { %v930_v60 = vpack.c.bf16 %v524_v59, %v522_v58 }
 0x148   :  { %875 = vmatpush1.bf16.msra.mxu0 %v874_v2 }
 0x149   :  { %881 = vmatpush3.bf16.msra.mxu1 %v880_v10  ;;  %901 = vmatprep.subr.bf16.mxu0 %v900_v6 }
 0x14a   :  { %882 = vmatprep.subr.bf16.mxu1 %v1090_v0 }
 0x14d   :  { %884 = vmatpush3.bf16.msra.mxu1 %v883_v19  ;;  %v902_v19 = vpack.c.bf16 %v496_v16, %v494_v15 }
 0x14e   :  { %885 = vmatprep.subr.bf16.mxu1 %v1090_v0 }
 0x151   :  { %887 = vmatpush3.bf16.msra.mxu1 %v886_v28  ;;  %v502_v28 = vld [vmem:[#allocation9 + $0x40] sm:$0xff] }
 0x152   :  { %888 = vmatprep.subr.bf16.mxu1 %v1090_v0  ;;  %v910_v32 = vpack.c.bf16 %v504_v29, %v502_v28 }
 0x155   :  { %890 = vmatpush3.bf16.msra.mxu1 %v889_v37  ;;  %v513_v37 = vld [vmem:[#allocation9 + $0x98] sm:$0xff] }
 0x156   :  { %891 = vmatprep.subr.bf16.mxu1 %v1090_v0  ;;  %v916_v39 = vpack.c.bf16 %v513_v37, %v511_v36 }
 0x159   :  { %893 = vmatpush3.bf16.msra.mxu1 %v892_v46  ;;  %v516_v46 = vld [vmem:[#allocation9 + $0xb0] sm:$0xff] }
 0x15a   :  { %894 = vmatprep.subr.bf16.mxu1 %v1090_v0  ;;  %v922_v50 = vpack.c.bf16 %v516_v46, %v514_v45 }
 0x15d   :  { %896 = vmatpush3.bf16.msra.mxu1 %v895_v56  ;;  %v926_v56 = vpack.c.bf16 %v520_v53, %v518_v52 }
 0x15e   :  { %897 = vmatprep.subr.bf16.mxu1 %v1090_v0  ;;  %v280_v0 = vand.u32 127, %v279_v14 }
 0x160   :  { %vm281_vm1 = vcmp.lt.s32.totalorder %v280_v0, 6 }
 0x161   :  { %899 = vmatpush3.bf16.msra.mxu1 %v898_v3 }
 0x217   :  { %v269_v8 = vpop.f32.mrb[0].mxu1 }
 0x218   :  { %v270_v9 = vadd.f32 %v633_v7, %v269_v8  ;;  %v760_v10 = vpop.f32.mrb[1].mxu1 }
 0x21a   :  { %v634_v11 = vmul.f32 -1.442695, %v270_v9 }
 0x21c   :  { %946 = vpow2.f32 %v634_v11  ;;  %v486_v11 = vstv %s1258_s0  ;;  %s1093_s0 = smov [#allocation11]  }
 0x21d   :  { %s621_s16 = sshll.u32 %s1093_s0, 4  ;;  %s622_s16 = int_to_ptr.vmem [resolvable:$true] %s621_s16 }
 0x21e   :  { %s1050_s19 = scalar_lea.vmem %s622_s16, 32  ;;  %p1055_p5 = scmp.lt.s32.totalorder %s622_s16, %s622_s16 }
 0x21f   :  { %p1051_p4 = scmp.ne.s32.totalorder %s622_s16, %s1050_s19  ;;  %p1056_p6 = scmp.lt.s32.totalorder %s1050_s19, %s1050_s19 }
 0x221   :  { %p1057_p7 = por %p1056_p6, %p1055_p5 }
 0x223   :  { %p1058_p8 = pnand %p1057_p7, %p1051_p4 }
 0x226   :  { %v947_v12 = vpop.eup %946 }
 0x227   :  { %v276_v13 = vadd.f32 1.0, %v947_v12  ;;  %v487_v12 = vmul.f32 %v486_v11, %v1216_v47 }
 0x229   :  { %948 = vrcp.f32 %v276_v13  ;;  %v637_v13 = vmul.f32 -1.442695, %v487_v12 }
 0x22b   :  { %950 = vpow2.f32 %v637_v13 }
 0x233   :  { %v949_v23 = vpop.eup %948 }
 0x234   :  { %635 = vmatmul.mubr.msk.f32.vlgmr.msra.gmra.mrb[2].mxu0 %vm281_vm1, %v949_v23  ;;  %794 = vmatmul.mubr.msk.f32.vlgmr.msra.gmra.mrb[2].mxu1 %vm281_vm1, %v949_v23 }
 0x235   :  { %903 = vmatpush1.bf16.msra.mxu0 %v902_v19  ;;  %590 = vmatprep.mubr.f32.mxu0 %v1092_v1  ;;  %v512_v1 = vld [vmem:[#allocation9 + $0x90] sm:$0xff]  ;;  %v951_v15 = vpop.eup %950 }
 0x236   :  { %905 = vmatprep.subr.bf16.mxu0 %v904_v20  ;;  %v918_v43 = vpack.c.bf16 %v512_v1, %v510_v40  ;;  %v491_v18 = vadd.f32 1.0, %v951_v15 }
 0x239   :  { %907 = vmatpush1.bf16.msra.mxu0 %v906_v26 }
 0x23a   :  { %909 = vmatprep.subr.bf16.mxu0 %v908_v27 }
 0x23d   :  { %911 = vmatpush1.bf16.msra.mxu0 %v910_v32 }
 0x23e   :  { %913 = vmatprep.subr.bf16.mxu0 %v912_v33 }
 0x241   :  { %915 = vmatpush1.bf16.msra.mxu0 %v914_v38 }
 0x242   :  { %917 = vmatprep.subr.bf16.mxu0 %v916_v39 }
 0x245   :  { %919 = vmatpush1.bf16.msra.mxu0 %v918_v43 }
 0x246   :  { %921 = vmatprep.subr.bf16.mxu0 %v920_v44 }
 0x249   :  { %923 = vmatpush1.bf16.msra.mxu0 %v922_v50 }
 0x24a   :  { %925 = vmatprep.subr.bf16.mxu0 %v924_v51 }
 0x24d   :  { %927 = vmatpush1.bf16.msra.mxu0 %v926_v56 }
 0x24e   :  { %929 = vmatprep.subr.bf16.mxu0 %v928_v57 }
 0x251   :  { %931 = vmatpush1.bf16.msra.mxu0 %v930_v60 }
 0x254   :  { %591 = vmatmul.mubr.f32.vlgmr.msra.gmra.mrb[4].mxu0 %v1216_v47 }
 0x307   :  { %v397_v61 = vpop.f32.mrb[2].mxu0  ;;  %v468_v62 = vpop.f32.mrb[2].mxu1 }
 0x308   :  { %v472_v63 = vmul.f32 %v397_v61, %v1216_v47  ;;  %v481_v2 = vmul.f32 %v468_v62, %v1216_v47  ;;  %v399_v3 = vpop.f32.mrb[3].mxu0  ;;  %v795_v4 = vpop.f32.mrb[3].mxu1 }
 0x309   :  { %v477_v5 = vmul.f32 %v399_v3, %v1216_v47 }
 0x30a   :  { %v482_v6 = vsel %vm473_vm2, %v481_v2, 0.0  ;;  %v474_v7 = vsel %vm473_vm2, %v472_v63, 0.0 }
 0x30b   :  { %483 = vadd.xlane.f32.xlu1 %v482_v6  ;;  %475 = vadd.xlane.f32.xlu0 %v474_v7  ;;  %v478_v8 = vsel %vm473_vm2, %v477_v5, 0.0 }
 0x30f   :  { %479 = vadd.xlane.f32.xlu0 %v478_v8 }
 0x327   :  { %v592_v9 = vpop.f32.mrb[4].mxu0 }
 0x328   :  { %v594_v10 = vpop.f32.mrb[5].mxu0  ;;  %v638_v0 = vmul.f32 -1.442695, %v592_v9 }
 0x329   :  { %v639_v14 = vmul.f32 -1.442695, %v594_v10 }
 0x32b   :  { %952 = vpow2.f32 %v639_v14 }
 0x32c   :  { %954 = vpow2.f32 %v638_v0 }
 0x32d   :  { %956 = vrcp.f32 %v491_v18 }
 0x335   :  { %v953_v16 = vpop.eup %952 }
 0x336   :  { %v955_v17 = vpop.eup %954  ;;  %v606_v19 = vadd.f32 1.0, %v953_v16 }
 0x337   :  { %v600_v20 = vadd.f32 1.0, %v955_v17  ;;  %v957_v22 = vpop.eup %956 }
 0x338   :  { %958 = vrcp.f32 %v606_v19 }
 0x339   :  { %960 = vrcp.f32 %v600_v20 }
 0x342   :  { %v959_v23 = vpop.eup %958 }
 0x343   :  { %v961_v24 = vpop.eup %960 }
 0x398   :  { %v476_v21 = vpop.xlane.xlu0 %475  ;;  %v484_v47 = vpop.xlane.xlu1 %483 }
 0x399   :  { %v609_v26 = vmul.f32 %v957_v22, %v476_v21  ;;  %v612_v28 = vmul.f32 %v961_v24, %v484_v47 }
 0x39c   :  { %v480_v25 = vpop.xlane.xlu0 %479 }
 0x39d   :  { %v610_v27 = vmul.f32 %v959_v23, %v480_v25 }
 0x39f   :  { %v611_v29 = vadd.f32 %v610_v27, %v609_v26 }
 0x3a1   :  { %v613_v30 = vadd.f32 %v612_v28, %v611_v29 }
 0x3a3   :  { %614 = vst [vmem:[#allocation11] sm:$0x3] %v613_v30 }
 0x3a4   :  { %1061 = shalt.err (!%p1058_p8)
}
 0x3a5   :  { %s1062_s30 = scalar_lea.hbm %s1266_s8, 32 }
 0x3a6   :  { %p1063_p9 = scmp.ne.s32.totalorder %s1266_s8, %s1062_s30  ;;  %p1066_p10 = scmp.lt.u32.totalorder %s1062_s30, %s1266_s8 }
 0x3a8   :  { %p1068_p11 = pnand %p1066_p10, %p1063_p9 }
 0x3aa   :  { %1071 = shalt.err (!%p1068_p11)
}
 0x3ab   :  { %624 = dma.vmem_to_hbm [thread:$0]  %s622_s16, 32, %s1266_s8, [#allocation5]  }
 0x3ac   :  { %1078 = dma.done.wait [#allocation5], 32  }
 0x3ad   :  { %1079 = vsyncadd [#allocation5], 4294967264 }
 0x3ae   :  { %628 = vsyncpa [#allocation4], 1 }
 0x3af   :  { %629 = vsyncpa [#allocation7], 1 }
 0x3b0   :  { %630 = vsyncpa [#allocation10], 1 }
 0x3b1   :  { %631 = vsyncpa [#allocation5], 1 }

</bundles_post_ra>
